<compile_context>
chip_gen: v6e
topology: v6e:2x2x1
jax: 0.10.0
libtpu: 0.0.40
codegen_flags: <defaults>
</compile_context>

<pallas_src>
import functools

import jax
import jax.numpy as jnp
import numpy as np
from jax.experimental import pallas as pl
from jax.experimental.pallas import tpu as pltpu

EPS = 1e-5
NEG_SLOPE = 0.2


def _round_up(x, m):
    return ((x + m - 1) // m) * m


def _vmem_limit_bytes():
    """~3/4 of physical VMEM: 48 MiB on v7x, 96 MiB on v5e/v6e."""
    try:
        cap = int(pltpu.get_tpu_info().vmem_capacity_bytes)
    except Exception:
        cap = 64 * 1024 * 1024  # conservative (v7x-class) fallback
    return (cap * 3) // 4


def _choose_cout_block(n, c_in, c_out, p_pad, l_f, ho, wo, itemsize, budget):
    """Largest C_out block whose per-step working set fits the VMEM budget;
    prefer >= 2 blocks when N == 1 so both v7x TensorCores stay busy."""
    f_bytes = 2 * _round_up(4 * c_in, 8) * l_f * itemsize          # phases (dbl-buf)
    mask_bytes = 2 * 8 * _round_up(p_pad, 128) * 4

    def fits(blk):
        w_b = 2 * _round_up(blk, 8) * 16 * c_in * itemsize          # weight (dbl-buf)
        out_b = 2 * _round_up(blk, 8) * _round_up(ho, 8) * _round_up(wo, 128) * itemsize
        acc_b = 3 * _round_up(blk, 8) * _round_up(p_pad, 128) * 4   # acc + temps
        return f_bytes + mask_bytes + w_b + out_b + acc_b <= budget

    cands = [d for d in range(c_out, 0, -1)
             if c_out % d == 0 and (d % 8 == 0 or d == c_out)]
    blk = next((d for d in cands if fits(d)), cands[-1])
    if n == 1 and blk == c_out and c_out % 16 == 0 and fits(c_out // 2):
        blk = c_out // 2  # split channels across the two v7x TensorCores
    return blk


def _unet_down_kernel(f_ref, w_ref, mask_ref, out_ref, *, c_in, ho, wo):
    """Fused conv(4x4, s2, p1) + InstanceNorm2d + LeakyReLU(0.2) for one sample
    and one block of output channels.

    f_ref:    (4*C_in, L_f)   4-phase split of the padded input, flattened with
                              row pitch Wo+1 (phase = 2*row_parity + col_parity)
    w_ref:    (COB, 16*C_in)  conv weight, tap-major: [:, tap*C_in:(tap+1)*C_in]
    mask_ref: (1, P_pad)      1.0 on real output columns, 0.0 on the pad column
    out_ref:  (COB, Ho, Wo)   final NCHW output block
    """
    wop = wo + 1
    p_pad = ho * wop

    # Conv as 16 accumulated matmuls over contiguous static slices of the
    # resident phase block (this *is* the im2col, done implicitly in VMEM).
    acc = None
    for kh in range(4):
        for kw in range(4):
            ph = 2 * (kh & 1) + (kw & 1)           # which parity phase
            off = (kh // 2) * wop + (kw // 2)      # static flat offset (0/1/Wo+1/Wo+2)
            x_slab = f_ref[ph * c_in:(ph + 1) * c_in, off:off + p_pad]   # (C_in, P_pad)
            tap = kh * 4 + kw
            w_tap = w_ref[:, tap * c_in:(tap + 1) * c_in]                # (COB, C_in)
            part = jnp.dot(w_tap, x_slab, preferred_element_type=jnp.float32)
            acc = part if acc is None else acc + part                    # (COB, P_pad) f32

    # InstanceNorm2d (affine=False, biased var, eps=1e-5) over the real P=Ho*Wo
    # positions only (mask kills the padded column), centered-variance form.
    valid = mask_ref[...]                                   # (1, P_pad)
    inv_p = 1.0 / float(ho * wo)
    mean = jnp.sum(acc * valid, axis=1, keepdims=True) * inv_p
    cen = (acc - mean) * valid
    var = jnp.sum(cen * cen, axis=1, keepdims=True) * inv_p
    normed = (acc - mean) * jax.lax.rsqrt(var + EPS)
    act = jnp.where(normed >= 0, normed, NEG_SLOPE * normed).astype(out_ref.dtype)

    # De-pad (drop the Wo-th column of each row) and store the NCHW block.
    for oh in range(ho):
        out_ref[:, oh, :] = act[:, oh * wop: oh * wop + wo]


def unet_down(x, weight):
    """x: (N, C_in, H, W) NCHW; weight: (C_out, C_in, 4, 4) PyTorch OIHW."""
    n, c_in, h, w = x.shape
    c_out = weight.shape[0]
    assert h % 2 == 0 and w % 2 == 0, "UNetDown expects even spatial dims"
    ho, wo = h // 2, w // 2
    wop = wo + 1                       # padded output row pitch
    p_pad = ho * wop                   # padded flat output length
    l_phase = (ho + 1) * wop           # flat length of one phase tensor
    l_f = _round_up(l_phase + 1, 128)  # room for the largest static tap offset

    # 4-phase split (row parity x col parity) of the 1-padded input, spatially
    # flattened.  ~1.03x input bytes vs. the 4x im2col blow-up it replaces.
    xp = jnp.pad(x, ((0, 0), (0, 0), (1, 1), (1, 1)))
    phases = [xp[:, :, a::2, b::2].reshape(n, c_in, l_phase)
              for a in (0, 1) for b in (0, 1)]
    f = jnp.concatenate(phases, axis=1)                       # (N, 4*C_in, L_phase)
    f = jnp.pad(f, ((0, 0), (0, 0), (0, l_f - l_phase)))      # (N, 4*C_in, L_f)

    # (C_out, C_in, 4, 4) -> (C_out, 16*C_in), tap-major so each tap's
    # (C_out, C_in) sub-matrix is one contiguous lane slice.
    w_mat = jnp.transpose(weight, (0, 2, 3, 1)).reshape(c_out, 16 * c_in)
    if w_mat.dtype != x.dtype:
        w_mat = w_mat.astype(x.dtype)  # e.g. bf16 activations -> bf16 MXU operands

    # Valid-column mask on the padded (Wo+1)-pitch output grid.
    mask = (jnp.arange(p_pad, dtype=jnp.int32) % wop != wo)
    mask = mask.astype(jnp.float32).reshape(1, p_pad)

    in_itemsize = jnp.dtype(x.dtype).itemsize
    vmem_limit = _vmem_limit_bytes()
    cob = _choose_cout_block(n, c_in, c_out, p_pad, l_f, ho, wo,
                             in_itemsize, budget=vmem_limit - (4 << 20))
    num_cob = c_out // cob

    kernel = functools.partial(_unet_down_kernel, c_in=c_in, ho=ho, wo=wo)
    out = pl.pallas_call(
        kernel,
        out_shape=jax.ShapeDtypeStruct((n, c_out, ho, wo), x.dtype),
        grid_spec=pltpu.PrefetchScalarGridSpec(
            num_scalar_prefetch=0,
            grid=(n, num_cob),
            in_specs=[
                # Phase block: resident per sample (index map ignores co).
                pl.BlockSpec((None, 4 * c_in, l_f), lambda b, co: (b, 0, 0)),
                # Weight block for this C_out block.
                pl.BlockSpec((cob, 16 * c_in), lambda b, co: (co, 0)),
                # Valid-column mask (grid-invariant).
                pl.BlockSpec((1, p_pad), lambda b, co: (0, 0)),
            ],
            out_specs=pl.BlockSpec((None, cob, ho, wo),
                                   lambda b, co: (b, co, 0, 0)),
        ),
        compiler_params=pltpu.CompilerParams(
            dimension_semantics=("parallel", "parallel"),
            vmem_limit_bytes=vmem_limit),
        cost_estimate=pl.CostEstimate(
            flops=2 * n * c_out * p_pad * 16 * c_in + 8 * n * c_out * p_pad,
            transcendentals=n * c_out,
            bytes_accessed=(n * 4 * c_in * l_f * in_itemsize
                            + n * c_out * 16 * c_in * in_itemsize
                            + n * c_out * ho * wo * in_itemsize)),
    )(f, w_mat, mask)
    return out


def _reference(x, weight):
    # Pure-JAX reference: conv -> instance norm (biased var) -> leaky relu
    y = jax.lax.conv_general_dilated(
        x.astype(jnp.float32), weight.astype(jnp.float32),
        window_strides=(2, 2), padding=((1, 1), (1, 1)),
        dimension_numbers=("NCHW", "OIHW", "NCHW"))
    mean = jnp.mean(y, axis=(2, 3), keepdims=True)
    var = jnp.mean((y - mean) ** 2, axis=(2, 3), keepdims=True)
    yn = (y - mean) / jnp.sqrt(var + EPS)
    return jnp.where(yn >= 0, yn, NEG_SLOPE * yn)


if __name__ == "__main__":
    key = jax.random.PRNGKey(0)
    kx, kw = jax.random.split(key)
    N, C_IN, C_OUT, H, W = 2, 4, 8, 16, 16
    x = jax.random.normal(kx, (N, C_IN, H, W), dtype=jnp.float32)
    # Deterministic synthetic weights (Conv2d: out_ch, in_ch, 4, 4), bias=False.
    weight = 0.1 * jax.random.normal(kw, (C_OUT, C_IN, 4, 4), dtype=jnp.float32)

    out = jax.block_until_ready(unet_down(x, weight))
    ref = jax.block_until_ready(_reference(x, weight))
    np.testing.assert_allclose(np.asarray(out), np.asarray(ref), rtol=1e-4, atol=1e-4)

    assert out.shape == (N, C_OUT, H // 2, W // 2)
    print("KERNEL_OK")
</pallas_src>

<mosaic_0001>
module attributes {stable_mosaic.version = 11 : i64} {
  func.func @_unet_down_kernel(%arg0: i32, %arg1: i32, %arg2: memref<1x16x128xf32, #tpu.memory_space<vmem>>, %arg3: memref<8x64xf32, #tpu.memory_space<vmem>>, %arg4: memref<1x72xf32, #tpu.memory_space<vmem>>, %arg5: memref<1x8x8x8xf32, #tpu.memory_space<vmem>>) attributes {dimension_semantics = [#tpu.dimension_semantics<parallel>, #tpu.dimension_semantics<parallel>], iteration_bounds = array<i64: 2, 1>, scalar_prefetch = 0 : i64, scratch_operands = 0 : i64, tpu.core_type = #tpu.core_type<tc>, window_params = [{transform_indices = @transform_0, window_bounds = array<i64: 1, 16, 128>}, {transform_indices = @transform_1, window_bounds = array<i64: 8, 64>}, {pipeline_mode = #tpu.pipeline_mode<synchronous>, transform_indices = @transform_2, window_bounds = array<i64: 1, 72>}, {transform_indices = @transform_3, window_bounds = array<i64: 1, 8, 8, 8>}]} {
    %c0 = arith.constant 0 : index
    %c0_0 = arith.constant 0 : index
    %c0_1 = arith.constant 0 : index
    %0 = vector.load %arg2[%c0, %c0_0, %c0_1] : memref<1x16x128xf32, #tpu.memory_space<vmem>>, vector<1x4x72xf32>
    %1 = vector.shape_cast %0 : vector<1x4x72xf32> to vector<4x72xf32>
    %c0_2 = arith.constant 0 : index
    %c0_3 = arith.constant 0 : index
    %2 = vector.load %arg3[%c0_2, %c0_3] : memref<8x64xf32, #tpu.memory_space<vmem>>, vector<8x4xf32>
    %cst = arith.constant dense<0.000000e+00> : vector<8x72xf32>
    %3 = tpu.matmul %2, %1, %cst {dimension_numbers = #tpu.dot_dimension_numbers<[1], [0], [0], [1], [0, 0, 1, 1], [], []>} : vector<8x4xf32>, vector<4x72xf32>, vector<8x72xf32> -> vector<8x72xf32>
    %c0_4 = arith.constant 0 : index
    %c4 = arith.constant 4 : index
    %c0_5 = arith.constant 0 : index
    %4 = vector.load %arg2[%c0_4, %c4, %c0_5] : memref<1x16x128xf32, #tpu.memory_space<vmem>>, vector<1x4x72xf32>
    %5 = vector.shape_cast %4 : vector<1x4x72xf32> to vector<4x72xf32>
    %c0_6 = arith.constant 0 : index
    %c4_7 = arith.constant 4 : index
    %6 = vector.load %arg3[%c0_6, %c4_7] : memref<8x64xf32, #tpu.memory_space<vmem>>, vector<8x4xf32>
    %cst_8 = arith.constant dense<0.000000e+00> : vector<8x72xf32>
    %7 = tpu.matmul %6, %5, %cst_8 {dimension_numbers = #tpu.dot_dimension_numbers<[1], [0], [0], [1], [0, 0, 1, 1], [], []>} : vector<8x4xf32>, vector<4x72xf32>, vector<8x72xf32> -> vector<8x72xf32>
    %8 = arith.addf %3, %7 : vector<8x72xf32>
    %c0_9 = arith.constant 0 : index
    %c0_10 = arith.constant 0 : index
    %c1 = arith.constant 1 : index
    %9 = vector.load %arg2[%c0_9, %c0_10, %c1] : memref<1x16x128xf32, #tpu.memory_space<vmem>>, vector<1x4x72xf32>
    %10 = vector.shape_cast %9 : vector<1x4x72xf32> to vector<4x72xf32>
    %c0_11 = arith.constant 0 : index
    %c8 = arith.constant 8 : index
    %11 = vector.load %arg3[%c0_11, %c8] : memref<8x64xf32, #tpu.memory_space<vmem>>, vector<8x4xf32>
    %cst_12 = arith.constant dense<0.000000e+00> : vector<8x72xf32>
    %12 = tpu.matmul %11, %10, %cst_12 {dimension_numbers = #tpu.dot_dimension_numbers<[1], [0], [0], [1], [0, 0, 1, 1], [], []>} : vector<8x4xf32>, vector<4x72xf32>, vector<8x72xf32> -> vector<8x72xf32>
    %13 = arith.addf %8, %12 : vector<8x72xf32>
    %c0_13 = arith.constant 0 : index
    %c4_14 = arith.constant 4 : index
    %c1_15 = arith.constant 1 : index
    %14 = vector.load %arg2[%c0_13, %c4_14, %c1_15] : memref<1x16x128xf32, #tpu.memory_space<vmem>>, vector<1x4x72xf32>
    %15 = vector.shape_cast %14 : vector<1x4x72xf32> to vector<4x72xf32>
    %c0_16 = arith.constant 0 : index
    %c12 = arith.constant 12 : index
    %16 = vector.load %arg3[%c0_16, %c12] : memref<8x64xf32, #tpu.memory_space<vmem>>, vector<8x4xf32>
    %cst_17 = arith.constant dense<0.000000e+00> : vector<8x72xf32>
    %17 = tpu.matmul %16, %15, %cst_17 {dimension_numbers = #tpu.dot_dimension_numbers<[1], [0], [0], [1], [0, 0, 1, 1], [], []>} : vector<8x4xf32>, vector<4x72xf32>, vector<8x72xf32> -> vector<8x72xf32>
    %18 = arith.addf %13, %17 : vector<8x72xf32>
    %c0_18 = arith.constant 0 : index
    %c8_19 = arith.constant 8 : index
    %c0_20 = arith.constant 0 : index
    %19 = vector.load %arg2[%c0_18, %c8_19, %c0_20] : memref<1x16x128xf32, #tpu.memory_space<vmem>>, vector<1x4x72xf32>
    %20 = vector.shape_cast %19 : vector<1x4x72xf32> to vector<4x72xf32>
    %c0_21 = arith.constant 0 : index
    %c16 = arith.constant 16 : index
    %21 = vector.load %arg3[%c0_21, %c16] : memref<8x64xf32, #tpu.memory_space<vmem>>, vector<8x4xf32>
    %cst_22 = arith.constant dense<0.000000e+00> : vector<8x72xf32>
    %22 = tpu.matmul %21, %20, %cst_22 {dimension_numbers = #tpu.dot_dimension_numbers<[1], [0], [0], [1], [0, 0, 1, 1], [], []>} : vector<8x4xf32>, vector<4x72xf32>, vector<8x72xf32> -> vector<8x72xf32>
    %23 = arith.addf %18, %22 : vector<8x72xf32>
    %c0_23 = arith.constant 0 : index
    %c12_24 = arith.constant 12 : index
    %c0_25 = arith.constant 0 : index
    %24 = vector.load %arg2[%c0_23, %c12_24, %c0_25] : memref<1x16x128xf32, #tpu.memory_space<vmem>>, vector<1x4x72xf32>
    %25 = vector.shape_cast %24 : vector<1x4x72xf32> to vector<4x72xf32>
    %c0_26 = arith.constant 0 : index
    %c20 = arith.constant 20 : index
    %26 = vector.load %arg3[%c0_26, %c20] : memref<8x64xf32, #tpu.memory_space<vmem>>, vector<8x4xf32>
    %cst_27 = arith.constant dense<0.000000e+00> : vector<8x72xf32>
    %27 = tpu.matmul %26, %25, %cst_27 {dimension_numbers = #tpu.dot_dimension_numbers<[1], [0], [0], [1], [0, 0, 1, 1], [], []>} : vector<8x4xf32>, vector<4x72xf32>, vector<8x72xf32> -> vector<8x72xf32>
    %28 = arith.addf %23, %27 : vector<8x72xf32>
    %c0_28 = arith.constant 0 : index
    %c8_29 = arith.constant 8 : index
    %c1_30 = arith.constant 1 : index
    %29 = vector.load %arg2[%c0_28, %c8_29, %c1_30] : memref<1x16x128xf32, #tpu.memory_space<vmem>>, vector<1x4x72xf32>
    %30 = vector.shape_cast %29 : vector<1x4x72xf32> to vector<4x72xf32>
    %c0_31 = arith.constant 0 : index
    %c24 = arith.constant 24 : index
    %31 = vector.load %arg3[%c0_31, %c24] : memref<8x64xf32, #tpu.memory_space<vmem>>, vector<8x4xf32>
    %cst_32 = arith.constant dense<0.000000e+00> : vector<8x72xf32>
    %32 = tpu.matmul %31, %30, %cst_32 {dimension_numbers = #tpu.dot_dimension_numbers<[1], [0], [0], [1], [0, 0, 1, 1], [], []>} : vector<8x4xf32>, vector<4x72xf32>, vector<8x72xf32> -> vector<8x72xf32>
    %33 = arith.addf %28, %32 : vector<8x72xf32>
    %c0_33 = arith.constant 0 : index
    %c12_34 = arith.constant 12 : index
    %c1_35 = arith.constant 1 : index
    %34 = vector.load %arg2[%c0_33, %c12_34, %c1_35] : memref<1x16x128xf32, #tpu.memory_space<vmem>>, vector<1x4x72xf32>
    %35 = vector.shape_cast %34 : vector<1x4x72xf32> to vector<4x72xf32>
    %c0_36 = arith.constant 0 : index
    %c28 = arith.constant 28 : index
    %36 = vector.load %arg3[%c0_36, %c28] : memref<8x64xf32, #tpu.memory_space<vmem>>, vector<8x4xf32>
    %cst_37 = arith.constant dense<0.000000e+00> : vector<8x72xf32>
    %37 = tpu.matmul %36, %35, %cst_37 {dimension_numbers = #tpu.dot_dimension_numbers<[1], [0], [0], [1], [0, 0, 1, 1], [], []>} : vector<8x4xf32>, vector<4x72xf32>, vector<8x72xf32> -> vector<8x72xf32>
    %38 = arith.addf %33, %37 : vector<8x72xf32>
    %c0_38 = arith.constant 0 : index
    %c0_39 = arith.constant 0 : index
    %c9 = arith.constant 9 : index
    %39 = vector.load %arg2[%c0_38, %c0_39, %c9] : memref<1x16x128xf32, #tpu.memory_space<vmem>>, vector<1x4x72xf32>
    %40 = vector.shape_cast %39 : vector<1x4x72xf32> to vector<4x72xf32>
    %c0_40 = arith.constant 0 : index
    %c32 = arith.constant 32 : index
    %41 = vector.load %arg3[%c0_40, %c32] : memref<8x64xf32, #tpu.memory_space<vmem>>, vector<8x4xf32>
    %cst_41 = arith.constant dense<0.000000e+00> : vector<8x72xf32>
    %42 = tpu.matmul %41, %40, %cst_41 {dimension_numbers = #tpu.dot_dimension_numbers<[1], [0], [0], [1], [0, 0, 1, 1], [], []>} : vector<8x4xf32>, vector<4x72xf32>, vector<8x72xf32> -> vector<8x72xf32>
    %43 = arith.addf %38, %42 : vector<8x72xf32>
    %c0_42 = arith.constant 0 : index
    %c4_43 = arith.constant 4 : index
    %c9_44 = arith.constant 9 : index
    %44 = vector.load %arg2[%c0_42, %c4_43, %c9_44] : memref<1x16x128xf32, #tpu.memory_space<vmem>>, vector<1x4x72xf32>
    %45 = vector.shape_cast %44 : vector<1x4x72xf32> to vector<4x72xf32>
    %c0_45 = arith.constant 0 : index
    %c36 = arith.constant 36 : index
    %46 = vector.load %arg3[%c0_45, %c36] : memref<8x64xf32, #tpu.memory_space<vmem>>, vector<8x4xf32>
    %cst_46 = arith.constant dense<0.000000e+00> : vector<8x72xf32>
    %47 = tpu.matmul %46, %45, %cst_46 {dimension_numbers = #tpu.dot_dimension_numbers<[1], [0], [0], [1], [0, 0, 1, 1], [], []>} : vector<8x4xf32>, vector<4x72xf32>, vector<8x72xf32> -> vector<8x72xf32>
    %48 = arith.addf %43, %47 : vector<8x72xf32>
    %c0_47 = arith.constant 0 : index
    %c0_48 = arith.constant 0 : index
    %c10 = arith.constant 10 : index
    %49 = vector.load %arg2[%c0_47, %c0_48, %c10] : memref<1x16x128xf32, #tpu.memory_space<vmem>>, vector<1x4x72xf32>
    %50 = vector.shape_cast %49 : vector<1x4x72xf32> to vector<4x72xf32>
    %c0_49 = arith.constant 0 : index
    %c40 = arith.constant 40 : index
    %51 = vector.load %arg3[%c0_49, %c40] : memref<8x64xf32, #tpu.memory_space<vmem>>, vector<8x4xf32>
    %cst_50 = arith.constant dense<0.000000e+00> : vector<8x72xf32>
    %52 = tpu.matmul %51, %50, %cst_50 {dimension_numbers = #tpu.dot_dimension_numbers<[1], [0], [0], [1], [0, 0, 1, 1], [], []>} : vector<8x4xf32>, vector<4x72xf32>, vector<8x72xf32> -> vector<8x72xf32>
    %53 = arith.addf %48, %52 : vector<8x72xf32>
    %c0_51 = arith.constant 0 : index
    %c4_52 = arith.constant 4 : index
    %c10_53 = arith.constant 10 : index
    %54 = vector.load %arg2[%c0_51, %c4_52, %c10_53] : memref<1x16x128xf32, #tpu.memory_space<vmem>>, vector<1x4x72xf32>
    %55 = vector.shape_cast %54 : vector<1x4x72xf32> to vector<4x72xf32>
    %c0_54 = arith.constant 0 : index
    %c44 = arith.constant 44 : index
    %56 = vector.load %arg3[%c0_54, %c44] : memref<8x64xf32, #tpu.memory_space<vmem>>, vector<8x4xf32>
    %cst_55 = arith.constant dense<0.000000e+00> : vector<8x72xf32>
    %57 = tpu.matmul %56, %55, %cst_55 {dimension_numbers = #tpu.dot_dimension_numbers<[1], [0], [0], [1], [0, 0, 1, 1], [], []>} : vector<8x4xf32>, vector<4x72xf32>, vector<8x72xf32> -> vector<8x72xf32>
    %58 = arith.addf %53, %57 : vector<8x72xf32>
    %c0_56 = arith.constant 0 : index
    %c8_57 = arith.constant 8 : index
    %c9_58 = arith.constant 9 : index
    %59 = vector.load %arg2[%c0_56, %c8_57, %c9_58] : memref<1x16x128xf32, #tpu.memory_space<vmem>>, vector<1x4x72xf32>
    %60 = vector.shape_cast %59 : vector<1x4x72xf32> to vector<4x72xf32>
    %c0_59 = arith.constant 0 : index
    %c48 = arith.constant 48 : index
    %61 = vector.load %arg3[%c0_59, %c48] : memref<8x64xf32, #tpu.memory_space<vmem>>, vector<8x4xf32>
    %cst_60 = arith.constant dense<0.000000e+00> : vector<8x72xf32>
    %62 = tpu.matmul %61, %60, %cst_60 {dimension_numbers = #tpu.dot_dimension_numbers<[1], [0], [0], [1], [0, 0, 1, 1], [], []>} : vector<8x4xf32>, vector<4x72xf32>, vector<8x72xf32> -> vector<8x72xf32>
    %63 = arith.addf %58, %62 : vector<8x72xf32>
    %c0_61 = arith.constant 0 : index
    %c12_62 = arith.constant 12 : index
    %c9_63 = arith.constant 9 : index
    %64 = vector.load %arg2[%c0_61, %c12_62, %c9_63] : memref<1x16x128xf32, #tpu.memory_space<vmem>>, vector<1x4x72xf32>
    %65 = vector.shape_cast %64 : vector<1x4x72xf32> to vector<4x72xf32>
    %c0_64 = arith.constant 0 : index
    %c52 = arith.constant 52 : index
    %66 = vector.load %arg3[%c0_64, %c52] : memref<8x64xf32, #tpu.memory_space<vmem>>, vector<8x4xf32>
    %cst_65 = arith.constant dense<0.000000e+00> : vector<8x72xf32>
    %67 = tpu.matmul %66, %65, %cst_65 {dimension_numbers = #tpu.dot_dimension_numbers<[1], [0], [0], [1], [0, 0, 1, 1], [], []>} : vector<8x4xf32>, vector<4x72xf32>, vector<8x72xf32> -> vector<8x72xf32>
    %68 = arith.addf %63, %67 : vector<8x72xf32>
    %c0_66 = arith.constant 0 : index
    %c8_67 = arith.constant 8 : index
    %c10_68 = arith.constant 10 : index
    %69 = vector.load %arg2[%c0_66, %c8_67, %c10_68] : memref<1x16x128xf32, #tpu.memory_space<vmem>>, vector<1x4x72xf32>
    %70 = vector.shape_cast %69 : vector<1x4x72xf32> to vector<4x72xf32>
    %c0_69 = arith.constant 0 : index
    %c56 = arith.constant 56 : index
    %71 = vector.load %arg3[%c0_69, %c56] : memref<8x64xf32, #tpu.memory_space<vmem>>, vector<8x4xf32>
    %cst_70 = arith.constant dense<0.000000e+00> : vector<8x72xf32>
    %72 = tpu.matmul %71, %70, %cst_70 {dimension_numbers = #tpu.dot_dimension_numbers<[1], [0], [0], [1], [0, 0, 1, 1], [], []>} : vector<8x4xf32>, vector<4x72xf32>, vector<8x72xf32> -> vector<8x72xf32>
    %73 = arith.addf %68, %72 : vector<8x72xf32>
    %c0_71 = arith.constant 0 : index
    %c12_72 = arith.constant 12 : index
    %c10_73 = arith.constant 10 : index
    %74 = vector.load %arg2[%c0_71, %c12_72, %c10_73] : memref<1x16x128xf32, #tpu.memory_space<vmem>>, vector<1x4x72xf32>
    %75 = vector.shape_cast %74 : vector<1x4x72xf32> to vector<4x72xf32>
    %c0_74 = arith.constant 0 : index
    %c60 = arith.constant 60 : index
    %76 = vector.load %arg3[%c0_74, %c60] : memref<8x64xf32, #tpu.memory_space<vmem>>, vector<8x4xf32>
    %cst_75 = arith.constant dense<0.000000e+00> : vector<8x72xf32>
    %77 = tpu.matmul %76, %75, %cst_75 {dimension_numbers = #tpu.dot_dimension_numbers<[1], [0], [0], [1], [0, 0, 1, 1], [], []>} : vector<8x4xf32>, vector<4x72xf32>, vector<8x72xf32> -> vector<8x72xf32>
    %78 = arith.addf %73, %77 : vector<8x72xf32>
    %c0_76 = arith.constant 0 : index
    %c0_77 = arith.constant 0 : index
    %79 = vector.load %arg4[%c0_76, %c0_77] : memref<1x72xf32, #tpu.memory_space<vmem>>, vector<1x72xf32>
    %80 = vector.broadcast %79 : vector<1x72xf32> to vector<8x72xf32>
    %81 = arith.mulf %78, %80 : vector<8x72xf32>
    %cst_78 = arith.constant dense<0.000000e+00> : vector<8xf32>
    %82 = vector.multi_reduction <add>, %81, %cst_78 [1] : vector<8x72xf32> to vector<8xf32>
    %83 = vector.shape_cast %82 : vector<8xf32> to vector<8x1xf32>
    %cst_79 = arith.constant 1.562500e-02 : f32
    %84 = vector.broadcast %cst_79 : f32 to vector<8x1xf32>
    %85 = arith.mulf %83, %84 : vector<8x1xf32>
    %86 = vector.broadcast %85 : vector<8x1xf32> to vector<8x72xf32>
    %87 = arith.subf %78, %86 : vector<8x72xf32>
    %88 = vector.broadcast %79 : vector<1x72xf32> to vector<8x72xf32>
    %89 = arith.mulf %87, %88 : vector<8x72xf32>
    %90 = arith.mulf %89, %89 : vector<8x72xf32>
    %cst_80 = arith.constant dense<0.000000e+00> : vector<8xf32>
    %91 = vector.multi_reduction <add>, %90, %cst_80 [1] : vector<8x72xf32> to vector<8xf32>
    %92 = vector.shape_cast %91 : vector<8xf32> to vector<8x1xf32>
    %cst_81 = arith.constant 1.562500e-02 : f32
    %93 = vector.broadcast %cst_81 : f32 to vector<8x1xf32>
    %94 = arith.mulf %92, %93 : vector<8x1xf32>
    %95 = vector.broadcast %85 : vector<8x1xf32> to vector<8x72xf32>
    %96 = arith.subf %78, %95 : vector<8x72xf32>
    %cst_82 = arith.constant 9.99999974E-6 : f32
    %97 = vector.broadcast %cst_82 : f32 to vector<8x1xf32>
    %98 = arith.addf %94, %97 : vector<8x1xf32>
    %99 = math.rsqrt %98 : vector<8x1xf32>
    %100 = vector.broadcast %99 : vector<8x1xf32> to vector<8x72xf32>
    %101 = arith.mulf %96, %100 : vector<8x72xf32>
    %cst_83 = arith.constant 0.000000e+00 : f32
    %102 = vector.broadcast %cst_83 : f32 to vector<8x72xf32>
    %103 = arith.cmpf oge, %101, %102 : vector<8x72xf32>
    %cst_84 = arith.constant 2.000000e-01 : f32
    %104 = vector.broadcast %cst_84 : f32 to vector<8x72xf32>
    %105 = arith.mulf %104, %101 : vector<8x72xf32>
    %106 = arith.select %103, %101, %105 : vector<8x72xi1>, vector<8x72xf32>
    %107 = vector.extract_strided_slice %106 {offsets = [0, 0], sizes = [8, 8], strides = [1, 1]} : vector<8x72xf32> to vector<8x8xf32>
    %c0_85 = arith.constant 0 : index
    %c0_86 = arith.constant 0 : index
    %c0_87 = arith.constant 0 : index
    %c0_88 = arith.constant 0 : index
    %108 = vector.load %arg5[%c0_85, %c0_86, %c0_87, %c0_88] : memref<1x8x8x8xf32, #tpu.memory_space<vmem>>, vector<1x8x1x8xf32>
    %109 = vector.shape_cast %108 : vector<1x8x1x8xf32> to vector<8x8xf32>
    %110 = vector.shape_cast %107 : vector<8x8xf32> to vector<1x8x1x8xf32>
    tpu.vector_store %arg5[%c0_85, %c0_86, %c0_87, %c0_88], %110 {strides = array<i32>} : memref<1x8x8x8xf32, #tpu.memory_space<vmem>>, vector<1x8x1x8xf32>,
    %111 = vector.extract_strided_slice %106 {offsets = [0, 9], sizes = [8, 8], strides = [1, 1]} : vector<8x72xf32> to vector<8x8xf32>
    %c0_89 = arith.constant 0 : index
    %c0_90 = arith.constant 0 : index
    %c1_91 = arith.constant 1 : index
    %c0_92 = arith.constant 0 : index
    %112 = vector.load %arg5[%c0_89, %c0_90, %c1_91, %c0_92] : memref<1x8x8x8xf32, #tpu.memory_space<vmem>>, vector<1x8x1x8xf32>
    %113 = vector.shape_cast %112 : vector<1x8x1x8xf32> to vector<8x8xf32>
    %114 = vector.shape_cast %111 : vector<8x8xf32> to vector<1x8x1x8xf32>
    tpu.vector_store %arg5[%c0_89, %c0_90, %c1_91, %c0_92], %114 {strides = array<i32>} : memref<1x8x8x8xf32, #tpu.memory_space<vmem>>, vector<1x8x1x8xf32>,
    %115 = vector.extract_strided_slice %106 {offsets = [0, 18], sizes = [8, 8], strides = [1, 1]} : vector<8x72xf32> to vector<8x8xf32>
    %c0_93 = arith.constant 0 : index
    %c0_94 = arith.constant 0 : index
    %c2 = arith.constant 2 : index
    %c0_95 = arith.constant 0 : index
    %116 = vector.load %arg5[%c0_93, %c0_94, %c2, %c0_95] : memref<1x8x8x8xf32, #tpu.memory_space<vmem>>, vector<1x8x1x8xf32>
    %117 = vector.shape_cast %116 : vector<1x8x1x8xf32> to vector<8x8xf32>
    %118 = vector.shape_cast %115 : vector<8x8xf32> to vector<1x8x1x8xf32>
    tpu.vector_store %arg5[%c0_93, %c0_94, %c2, %c0_95], %118 {strides = array<i32>} : memref<1x8x8x8xf32, #tpu.memory_space<vmem>>, vector<1x8x1x8xf32>,
    %119 = vector.extract_strided_slice %106 {offsets = [0, 27], sizes = [8, 8], strides = [1, 1]} : vector<8x72xf32> to vector<8x8xf32>
    %c0_96 = arith.constant 0 : index
    %c0_97 = arith.constant 0 : index
    %c3 = arith.constant 3 : index
    %c0_98 = arith.constant 0 : index
    %120 = vector.load %arg5[%c0_96, %c0_97, %c3, %c0_98] : memref<1x8x8x8xf32, #tpu.memory_space<vmem>>, vector<1x8x1x8xf32>
    %121 = vector.shape_cast %120 : vector<1x8x1x8xf32> to vector<8x8xf32>
    %122 = vector.shape_cast %119 : vector<8x8xf32> to vector<1x8x1x8xf32>
    tpu.vector_store %arg5[%c0_96, %c0_97, %c3, %c0_98], %122 {strides = array<i32>} : memref<1x8x8x8xf32, #tpu.memory_space<vmem>>, vector<1x8x1x8xf32>,
    %123 = vector.extract_strided_slice %106 {offsets = [0, 36], sizes = [8, 8], strides = [1, 1]} : vector<8x72xf32> to vector<8x8xf32>
    %c0_99 = arith.constant 0 : index
    %c0_100 = arith.constant 0 : index
    %c4_101 = arith.constant 4 : index
    %c0_102 = arith.constant 0 : index
    %124 = vector.load %arg5[%c0_99, %c0_100, %c4_101, %c0_102] : memref<1x8x8x8xf32, #tpu.memory_space<vmem>>, vector<1x8x1x8xf32>
    %125 = vector.shape_cast %124 : vector<1x8x1x8xf32> to vector<8x8xf32>
    %126 = vector.shape_cast %123 : vector<8x8xf32> to vector<1x8x1x8xf32>
    tpu.vector_store %arg5[%c0_99, %c0_100, %c4_101, %c0_102], %126 {strides = array<i32>} : memref<1x8x8x8xf32, #tpu.memory_space<vmem>>, vector<1x8x1x8xf32>,
    %127 = vector.extract_strided_slice %106 {offsets = [0, 45], sizes = [8, 8], strides = [1, 1]} : vector<8x72xf32> to vector<8x8xf32>
    %c0_103 = arith.constant 0 : index
    %c0_104 = arith.constant 0 : index
    %c5 = arith.constant 5 : index
    %c0_105 = arith.constant 0 : index
    %128 = vector.load %arg5[%c0_103, %c0_104, %c5, %c0_105] : memref<1x8x8x8xf32, #tpu.memory_space<vmem>>, vector<1x8x1x8xf32>
    %129 = vector.shape_cast %128 : vector<1x8x1x8xf32> to vector<8x8xf32>
    %130 = vector.shape_cast %127 : vector<8x8xf32> to vector<1x8x1x8xf32>
    tpu.vector_store %arg5[%c0_103, %c0_104, %c5, %c0_105], %130 {strides = array<i32>} : memref<1x8x8x8xf32, #tpu.memory_space<vmem>>, vector<1x8x1x8xf32>,
    %131 = vector.extract_strided_slice %106 {offsets = [0, 54], sizes = [8, 8], strides = [1, 1]} : vector<8x72xf32> to vector<8x8xf32>
    %c0_106 = arith.constant 0 : index
    %c0_107 = arith.constant 0 : index
    %c6 = arith.constant 6 : index
    %c0_108 = arith.constant 0 : index
    %132 = vector.load %arg5[%c0_106, %c0_107, %c6, %c0_108] : memref<1x8x8x8xf32, #tpu.memory_space<vmem>>, vector<1x8x1x8xf32>
    %133 = vector.shape_cast %132 : vector<1x8x1x8xf32> to vector<8x8xf32>
    %134 = vector.shape_cast %131 : vector<8x8xf32> to vector<1x8x1x8xf32>
    tpu.vector_store %arg5[%c0_106, %c0_107, %c6, %c0_108], %134 {strides = array<i32>} : memref<1x8x8x8xf32, #tpu.memory_space<vmem>>, vector<1x8x1x8xf32>,
    %135 = vector.extract_strided_slice %106 {offsets = [0, 63], sizes = [8, 8], strides = [1, 1]} : vector<8x72xf32> to vector<8x8xf32>
    %c0_109 = arith.constant 0 : index
    %c0_110 = arith.constant 0 : index
    %c7 = arith.constant 7 : index
    %c0_111 = arith.constant 0 : index
    %136 = vector.load %arg5[%c0_109, %c0_110, %c7, %c0_111] : memref<1x8x8x8xf32, #tpu.memory_space<vmem>>, vector<1x8x1x8xf32>
    %137 = vector.shape_cast %136 : vector<1x8x1x8xf32> to vector<8x8xf32>
    %138 = vector.shape_cast %135 : vector<8x8xf32> to vector<1x8x1x8xf32>
    tpu.vector_store %arg5[%c0_109, %c0_110, %c7, %c0_111], %138 {strides = array<i32>} : memref<1x8x8x8xf32, #tpu.memory_space<vmem>>, vector<1x8x1x8xf32>,
    return
  }
  func.func @transform_0(%arg0: i32, %arg1: i32) -> (i32, i32, i32) {
    %c0_i32 = arith.constant 0 : i32
    %c0_i32_0 = arith.constant 0 : i32
    %c0_i32_1 = arith.constant 0 : i32
    return %arg0, %c0_i32, %c0_i32_0 : i32, i32, i32
  }
  func.func @transform_1(%arg0: i32, %arg1: i32) -> (i32, i32) {
    %c0_i32 = arith.constant 0 : i32
    %c0_i32_0 = arith.constant 0 : i32
    return %arg1, %c0_i32 : i32, i32
  }
  func.func @transform_2(%arg0: i32, %arg1: i32) -> (i32, i32) {
    %c0_i32 = arith.constant 0 : i32
    %c0_i32_0 = arith.constant 0 : i32
    %c0_i32_1 = arith.constant 0 : i32
    return %c0_i32, %c0_i32_0 : i32, i32
  }
  func.func @transform_3(%arg0: i32, %arg1: i32) -> (i32, i32, i32, i32) {
    %c0_i32 = arith.constant 0 : i32
    %c0_i32_0 = arith.constant 0 : i32
    %c0_i32_1 = arith.constant 0 : i32
    return %arg0, %arg1, %c0_i32, %c0_i32_0 : i32, i32, i32, i32
  }
}

</mosaic_0001>

<bundles_post_ra>
// kernel: tpu_custom_call.1
= control target key start
LH: loop header
LB: loop body
LE: loop exit
PB: predicated region body
PF: predicated region fallthrough
CT: control target
= control target key end

     0   :  { %s2879_s0 = inlined_call_operand.hbm [shape: f32[2,16,128], index: 0, kind: input, shape index: {}]   ;;  %s2880_s1 = inlined_call_operand.hbm [shape: f32[8,64], index: 1, kind: input, shape index: {}]   ;;  %s2881_s2 = inlined_call_operand.vmem [shape: f32[1,72], index: 2, kind: input, shape index: {}]   ;;  %s2882_s3 = inlined_call_operand.hbm [shape: f32[2,8,8,8], index: 3, kind: output, shape index: {}]  }
   0x1   :  { %2885 = sst [smem:[#allocation11_spill]] %s2880_s1 }
   0x2   :  { %8 = vsyncpa [#allocation3], 0 }
   0x3   :  { %10 = vsyncpa [#allocation3 + $0x1], 0 }
   0x4   :  { %11 = vsyncpa [#allocation6], 0 }
   0x5   :  { %12 = vsyncpa [#allocation4], 0 }
   0x6   :  { %14 = vsyncpa [#allocation4 + $0x1], 0  ;;  %s2411_s12 = smov 0   ;;  %s2413_s13 = smov 0  }
   0x7   :  { %s2415_s14 = smov 0   ;;  %s2417_s15 = smov 0  }
   0x8   :  { %s2419_s16 = smov 0   ;;  %s2421_s17 = smov 0  }
   0x9 LB: > { %s1949_s18 = sadd.s32 4294967295, %s2356_s17   ;;  %s1950_s19 = sadd.s32 4294967294, %s2356_s17   ;;  %s2356_s17 = sphi %s2421_s17, %s20_s17   ;;  %s2352_s16 = sphi %s2419_s16, %s2903_s16   ;;  %s2348_s15 = sphi %s2417_s15, %s2902_s15   ;;  %s2344_s14 = sphi %s2415_s14, %s2901_s14   ;;  %s2340_s13 = sphi %s2413_s13, %s2900_s13   ;;  %s2336_s12 = sphi %s2411_s12, %s2899_s12  }
   0xa   : > { %s39_s20 = sadd.s32 1, %s2344_s14  ;;  %p46_p0 = scmp.ne.s32.totalorder %s2344_s14, %s2340_s13 }
   0xb   : > { %p47_p1 = scmp.eq.s32.totalorder %s2356_s17, 0  ;;  %p52_p2 = scmp.ne.s32.totalorder %s2340_s13, %s2336_s12 }
   0xc   : > { %p2449_p3 = scmp.eq.s32.totalorder %s1949_s18, 0  ;;  %p125_p4 = scmp.eq.s32.totalorder %s1949_s18, 1 }
   0xd   : > { %p2453_p5 = por %p47_p1, %p46_p0  ;;  %p131_p6 = scmp.eq.s32.totalorder %s1950_s19, 1 }
   0xe   : > { %p2459_p7 = por %p2449_p3, %p52_p2  ;;  %p2463_p8 = por %p125_p4, %p46_p0 }
   0xf   : > { %p2467_p9 = por %p131_p6, %p52_p2  ;;  %p1951_p10 = scmp.ge.s32.totalorder %s2356_s17, 1 }
  0x10   : > { %s2888_s23 = scalar_select %p2459_p7, 1, 0 }
  0x11   : > { %s2889_s24 = scalar_select %p2463_p8, 1, 0 }
  0x12   : > { %s2890_s25 = scalar_select %p2467_p9, 1, 0 }
  0x13   : > { %p138_p11 = scmp.lt.s32.totalorder %s2356_s17, 3  ;;  %s2358_s27 = smov [#allocation5]  }
  0x14   : > { %s153_s28 = sshll.u32 %s2358_s27, 4  ;;  %p2134_p1 = scmp.lt.s32.totalorder %s2356_s17, 2  ;;  %s154_s28 = int_to_ptr.vmem [resolvable:$true] %s153_s28 }
  0x15   : > { %p2474_p13 = pnand %p1951_p10, %p138_p11  ;;  %s32_s4 = sadd.s32 1, %s2352_s16 }
  0x16   : > { %p2483_p4 = pnand %p2134_p1, %p2453_p5  ;;  %p34_p6 = scmp.ge.s32.totalorder %s32_s4, 2 }
  0x17   : > { %p2121_p0 = pneg %p2474_p13  ;;  %s167_s5 = sand.u32 1, %s2344_s14  }
  0x18   : > { %s2229_s6 = scalar_lea.vmem %s154_s28, 128  ;;  %p2237_p8 = scmp.lt.s32.totalorder %s154_s28, %s154_s28 }
  0x19   : > { %p2489_p2 = pnand %p2121_p0, %p2449_p3  ;;  %p2230_p11 = scmp.ne.s32.totalorder %s154_s28, %s2229_s6 }
  0x1a   : > { %p2238_p5 = scmp.lt.s32.totalorder %s2229_s6, %s2229_s6 }
  0x1b   : > { %p2220_p10 = pneg %p2489_p2 }
  0x1c   : > { %p2239_p1 = por %p2238_p5, %p2237_p8 }
  0x1d   : > { %p2232_p12 = pnand %p2230_p11, %p2220_p10 }
  0x1f   : > { %p2233_p9 = pneg %p2232_p12 }
  0x21   : > { %p2240_p7 = pnand %p2239_p1, %p2233_p9 }
  0x23   : > { %2243 = shalt.err (!%p2240_p7)
}
  0x24   : > { %s2894_s1 = sld [smem:[#allocation11_spill]]  ;;  %s2905_s4 = smov (%p34_p6, %s32_s4), 0 }
  0x25   : > { %s1954_s9 = sshll.u32 %s167_s5, 4  ;;  %s36_s10 = ssub.s32 %s2352_s16, %s2905_s4 }
  0x26   : > { %p37_p12 = scmp.eq.s32.totalorder %s36_s10, 0  ;;  %s1999_s11 = sshll.u32 %s2352_s16, 8 }
  0x27   : > { %s177_s22 = scalar_lea.hbm %s2879_s0, %s1999_s11  ;;  %s171_s27 = scalar_lea.vmem [#allocation2], %s1954_s9 }
  0x28   : > { %s178_s30 = sshll.u32 %s171_s27, 4  ;;  %s168_s7 = scalar_lea.sflag [#allocation3], %s167_s5  ;;  %s179_s30 = int_to_ptr.vmem [resolvable:$true] %s178_s30 }
  0x29   : > { %s2513_s6 = scalar_select %p37_p12, %s2344_s14, %s39_s20  }
  0x2a   : > { %2124 = dma.hbm_to_vmem [thread:$0]  (!%p2489_p2), %s2894_s1, 128, %s154_s28, [#allocation6]  }
  0x2b   : > { %p2246_p7 = pneg %p2483_p4  ;;  %s2257_s28 = scalar_lea.vmem %s179_s30, 256 }
  0x2c   : > { %p2258_p8 = scmp.ne.s32.totalorder %s179_s30, %s2257_s28  ;;  %s2359_s8 = smov [#allocation2]  }
  0x2d   : > { %s2262_s10 = sshll.u32 %s2359_s8, 4  ;;  %s2263_s10 = int_to_ptr.vmem [resolvable:$false] %s2262_s10 }
  0x2e   : > { %p2260_p9 = pnand %p2258_p8, %p2246_p7  ;;  %s2264_s1 = scalar_lea.vmem %s2263_s10, 512 }
  0x2f   : > { %p2265_p2 = scmp.lt.s32.totalorder %s179_s30, %s2263_s10  ;;  %p2266_p6 = scmp.lt.s32.totalorder %s2264_s1, %s2257_s28 }
  0x30   : > { %p2261_p0 = pneg %p2260_p9 }
  0x31   : > { %p2267_p10 = por %p2266_p6, %p2265_p2 }
  0x33   : > { %p2268_p11 = pnand %p2267_p10, %p2261_p0 }
  0x35   : > { %2271 = shalt.err (!%p2268_p11)
}
  0x36   : > { %s2360_s9 = smov 128   ;;  %s2361_s20 = smov 8  }
  0x37   : > { %2128 = dma.hbm_to_vmem [thread:$0]  (!%p2483_p4), %s177_s22, 256, %s179_s30, %s168_s7, %s2360_s9, %s2360_s9, %s2361_s20  }
  0x38   : > { %190 = sbr.rel (%p2474_p13) target bundleno = 983 (0x3d7), region = 32  ;;  %s2522_s5 = sand.u32 (!%p2474_p13), 1, %s2340_s13  }
  0x39   : > { %s1958_s11 = sshll.u32 (!%p2474_p13), %s2522_s5, 4  ;;  %s193_s18 = scalar_lea.sflag (!%p2474_p13), [#allocation3], %s2522_s5 }
  0x3a   : > { %s2526_s1 = scalar_lea.vmem (!%p2474_p13), [#allocation2], %s1958_s11  ;;  %p2895_p5 = scmp.ne.s32.totalorder (!%p2474_p13), %s2888_s23, 0 }
  0x3d   : > { %2323 = dma.done.wait (%p2895_p5), %s193_s18, 256  }
  0x3e   : > { %2325 = vsyncadd (%p2895_p5), %s193_s18, 4294967040 }
  0x3f   : > { %2327 = dma.done.wait (%p2449_p3), [#allocation6], 128  }
  0x40   : > { %2329 = vsyncadd (%p2449_p3), [#allocation6], 4294967168  ;;  %v2362_v0 = vmov 0.0   ;;  %vm2363_vm0 = vmmov 0   ;;  %vm233_vm1 = vcmask 1043456   ;;  %v225_v1 = vld [vmem:[#allocation5] sm:$0xff] }
  0x41   : > { %2033 = vmatprep.subr.mxu0 %v2362_v0  ;;  %2038 = vmatprep.subr.mxu1 %v2362_v0  ;;  %vm230_vm2 = vcmask 31744   ;;  %s2364_s23 = smov 120   ;;  %s2365_s21 = smov 124   ;;  %v226_v2 = vld [vmem:[%s2526_s1 + $0x4] sm:$0xf]  ;;  %vm1496_vm3 = vcmask 588800  }
  0x42   : > { %2035 = vmatprep.mubr.msk.f32.mxu0 %vm2363_vm0, %v2362_v0  ;;  %2040 = vmatprep.mubr.msk.f32.mxu1 %vm2363_vm0, %v2362_v0  ;;  %v224_v3 = vld [vmem:[%s2526_s1] sm:$0xf]  ;;  %s2366_s26 = smov 127   ;;  %s2367_s29 = smov 112   ;;  %v540_v4 = vld [vmem:[%s2526_s1 + $0x8] sm:$0xf] }
  0x43   : > { %382 = vrot.lane.b32.xlu1 %v225_v1, %s2364_s23  ;;  %228 = vrot.lane.b32.xlu0 %v225_v1, %s2365_s21  ;;  %s2368_s19 = smov 116   ;;  %s2369_s22 = smov 108   ;;  %v619_v5 = vld [vmem:[%s2526_s1 + $0xc] sm:$0xf]  ;;  %vm1572_vm5 = vcmask 57344  }
  0x44   : > { %2034 = vmatpush3.msk.msra.mxu0 %vm233_vm1, %v226_v2  ;;  %2039 = vmatpush3.msk.msra.mxu1 %vm233_vm1, %v224_v3  ;;  %s2370_s27 = smov 104   ;;  %s2371_s30 = smov 119  }
  0x45   : > { %2041 = vmatmul.mubr.msk.f32.vlgmr.msra.gmra.mxu1 %vm230_vm2, %v225_v1  ;;  %2043 = vmatprep.subr.mxu0 %v2362_v0  ;;  %s2372_s7 = smov 100   ;;  %s2373_s28 = smov 96  }
  0x46   : > { %2048 = vmatprep.subr.mxu1 %v2362_v0  ;;  %2050 = vmatprep.mubr.msk.f32.mxu1 %vm2363_vm0, %v2362_v0  ;;  %s2374_s8 = smov 118   ;;  %s2375_s10 = smov 92  }
  0x47   : > { %463 = vrot.lane.b32.xlu1 %v226_v2, %s2366_s26  ;;  %384 = vrot.lane.b32.xlu0 %v224_v3, %s2366_s26  ;;  %s2376_s9 = smov 88   ;;  %s2377_s20 = smov 84  }
  0x48   : > { %s2378_s11 = smov 80   ;;  %s2379_s18 = smov 76  }
  0x49   : > { %s2380_s1 = smov 72   ;;  %s2381_s23 = smov 68  }
  0x4a   : > { %p2896_p13 = scmp.ne.s32.totalorder %s2889_s24, 0 }
  0x4b   : > { %541 = vrot.lane.b32.xlu1 %v225_v1, %s2367_s29  ;;  %461 = vrot.lane.b32.xlu0 %v225_v1, %s2368_s19  ;;  %s1960_s29 = sshll.u32 %s2522_s5, 6 }
  0x4c   : > { %s2629_s19 = scalar_lea.vmem [#allocation7], %s1960_s29 }
  0x4f   : > { %700 = vrot.lane.b32.xlu1 %v540_v4, %s2366_s26  ;;  %620 = vrot.lane.b32.xlu0 %v225_v1, %s2369_s22  ;;  %s2383_s22 = smov 110  }
  0x53   : > { %779 = vrot.lane.b32.xlu1 %v619_v5, %s2366_s26  ;;  %698 = vrot.lane.b32.xlu0 %v225_v1, %s2370_s27  ;;  %s2384_s27 = smov 101  }
  0x57   : > { %858 = vrot.lane.b32.xlu1 %v224_v3, %s2371_s30  ;;  %777 = vrot.lane.b32.xlu0 %v225_v1, %s2372_s7  ;;  %s2385_s7 = smov 83  }
  0x5b   : > { %937 = vrot.lane.b32.xlu1 %v226_v2, %s2371_s30  ;;  %856 = vrot.lane.b32.xlu0 %v225_v1, %s2373_s28  ;;  %s2386_s28 = smov 74  }
  0x5f   : > { %1016 = vrot.lane.b32.xlu1 %v224_v3, %s2374_s8  ;;  %935 = vrot.lane.b32.xlu0 %v225_v1, %s2375_s10 }
  0x63   : > { %1095 = vrot.lane.b32.xlu1 %v226_v2, %s2374_s8  ;;  %1014 = vrot.lane.b32.xlu0 %v225_v1, %s2376_s9 }
  0x67   : > { %1174 = vrot.lane.b32.xlu1 %v540_v4, %s2371_s30  ;;  %1093 = vrot.lane.b32.xlu0 %v225_v1, %s2377_s20 }
  0x6b   : > { %1253 = vrot.lane.b32.xlu1 %v619_v5, %s2371_s30  ;;  %1172 = vrot.lane.b32.xlu0 %v225_v1, %s2378_s11 }
  0x6f   : > { %1332 = vrot.lane.b32.xlu1 %v540_v4, %s2374_s8  ;;  %1251 = vrot.lane.b32.xlu0 %v225_v1, %s2379_s18 }
  0x73   : > { %1411 = vrot.lane.b32.xlu1 %v619_v5, %s2374_s8  ;;  %1330 = vrot.lane.b32.xlu0 %v225_v1, %s2380_s1  ;;  %s2387_s8 = smov 65   ;;  %s2388_s1 = smov [#allocation7]  }
  0x77   : > { %1409 = vrot.lane.b32.xlu0 %v225_v1, %s2381_s23  ;;  %s2276_s23 = sshll.u32 %s2388_s1, 4  ;;  %s2277_s23 = int_to_ptr.vmem [resolvable:$false] %s2276_s23 }
  0x78   : > { %s2278_s21 = scalar_lea.vmem %s2277_s23, 2048 }
  0xb5   : > { %v383_v6 = vpop.permute.xlu1 %382  ;;  %v229_v7 = vpop.permute.xlu0 %228 }
  0xb6   : > { %2036 = vmatmul.mubr.msk.f32.vlgmr.msra.gmra.mxu0 %vm230_vm2, %v229_v7 }
  0xb7   : > { %2045 = vmatprep.mubr.msk.f32.mxu0 %vm2363_vm0, %v2362_v0 }
  0xb9   : > { %v464_v8 = vpop.permute.xlu1 %463  ;;  %v385_v9 = vpop.permute.xlu0 %384 }
  0xba   : > { %2044 = vmatpush3.msk.msra.mxu0 %vm233_vm1, %v385_v9  ;;  %2049 = vmatpush3.msk.msra.mxu1 %vm233_vm1, %v464_v8 }
  0xbb   : > { %2046 = vmatmul.mubr.msk.f32.vlgmr.msra.gmra.mxu0 %vm230_vm2, %v383_v6  ;;  %2053 = vmatprep.subr.mxu0 %v2362_v0 }
  0xbc   : > { %2054 = vmatpush3.msk.msra.mxu0 %vm233_vm1, %v540_v4  ;;  %2055 = vmatprep.mubr.msk.f32.mxu0 %vm2363_vm0, %v2362_v0 }
  0xbd   : > { %v542_v10 = vpop.permute.xlu1 %541  ;;  %v462_v11 = vpop.permute.xlu0 %461  ;;  %2058 = vmatprep.subr.mxu1 %v2362_v0  ;;  %2063 = vmatprep.subr.mxu0 %v2362_v0 }
  0xbe   : > { %2051 = vmatmul.mubr.msk.f32.vlgmr.msra.gmra.mxu1 %vm230_vm2, %v462_v11 }
  0xbf   : > { %2056 = vmatmul.mubr.msk.f32.vlgmr.msra.gmra.mxu0 %vm230_vm2, %v542_v10  ;;  %2059 = vmatpush3.msk.msra.mxu1 %vm233_vm1, %v619_v5 }
  0xc0   : > { %2060 = vmatprep.mubr.msk.f32.mxu1 %vm2363_vm0, %v2362_v0  ;;  %2065 = vmatprep.mubr.msk.f32.mxu0 %vm2363_vm0, %v2362_v0 }
  0xc1   : > { %v701_v12 = vpop.permute.xlu1 %700  ;;  %v621_v13 = vpop.permute.xlu0 %620  ;;  %2068 = vmatprep.subr.mxu1 %v2362_v0 }
  0xc2   : > { %2061 = vmatmul.mubr.msk.f32.vlgmr.msra.gmra.mxu1 %vm230_vm2, %v621_v13  ;;  %2064 = vmatpush3.msk.msra.mxu0 %vm233_vm1, %v701_v12 }
  0xc3   : > { %2073 = vmatprep.subr.mxu0 %v2362_v0  ;;  %2070 = vmatprep.mubr.msk.f32.mxu1 %vm2363_vm0, %v2362_v0 }
  0xc5   : > { %v780_v14 = vpop.permute.xlu1 %779  ;;  %v699_v15 = vpop.permute.xlu0 %698 }
  0xc6   : > { %2066 = vmatmul.mubr.msk.f32.vlgmr.msra.gmra.mxu0 %vm230_vm2, %v699_v15  ;;  %2069 = vmatpush3.msk.msra.mxu1 %vm233_vm1, %v780_v14  ;;  %v1993_v14 = vld [vmem:[%s2881_s2] ss:$0 sm:$0xff] }
  0xc7   : > { %2075 = vmatprep.mubr.msk.f32.mxu0 %vm2363_vm0, %v2362_v0  ;;  %2078 = vmatprep.subr.mxu1 %v2362_v0 }
  0xc9   : > { %v859_v16 = vpop.permute.xlu1 %858  ;;  %v778_v17 = vpop.permute.xlu0 %777 }
  0xca   : > { %2071 = vmatmul.mubr.msk.f32.vlgmr.msra.gmra.mxu1 %vm230_vm2, %v778_v17  ;;  %2074 = vmatpush3.msk.msra.mxu0 %vm233_vm1, %v859_v16 }
  0xcb   : > { %2083 = vmatprep.subr.mxu0 %v2362_v0  ;;  %2080 = vmatprep.mubr.msk.f32.mxu1 %vm2363_vm0, %v2362_v0 }
  0xcd   : > { %v938_v18 = vpop.permute.xlu1 %937  ;;  %v857_v19 = vpop.permute.xlu0 %856 }
  0xce   : > { %2076 = vmatmul.mubr.msk.f32.vlgmr.msra.gmra.mxu0 %vm230_vm2, %v857_v19  ;;  %2079 = vmatpush3.msk.msra.mxu1 %vm233_vm1, %v938_v18 }
  0xcf   : > { %2085 = vmatprep.mubr.msk.f32.mxu0 %vm2363_vm0, %v2362_v0  ;;  %2088 = vmatprep.subr.mxu1 %v2362_v0 }
  0xd1   : > { %v1017_v20 = vpop.permute.xlu1 %1016  ;;  %v936_v21 = vpop.permute.xlu0 %935 }
  0xd2   : > { %2081 = vmatmul.mubr.msk.f32.vlgmr.msra.gmra.mxu1 %vm230_vm2, %v936_v21  ;;  %2084 = vmatpush3.msk.msra.mxu0 %vm233_vm1, %v1017_v20 }
  0xd3   : > { %2093 = vmatprep.subr.mxu0 %v2362_v0  ;;  %2090 = vmatprep.mubr.msk.f32.mxu1 %vm2363_vm0, %v2362_v0 }
  0xd5   : > { %v1096_v22 = vpop.permute.xlu1 %1095  ;;  %v1015_v23 = vpop.permute.xlu0 %1014 }
  0xd6   : > { %2086 = vmatmul.mubr.msk.f32.vlgmr.msra.gmra.mxu0 %vm230_vm2, %v1015_v23  ;;  %2089 = vmatpush3.msk.msra.mxu1 %vm233_vm1, %v1096_v22 }
  0xd7   : > { %2095 = vmatprep.mubr.msk.f32.mxu0 %vm2363_vm0, %v2362_v0  ;;  %2098 = vmatprep.subr.mxu1 %v2362_v0 }
  0xd9   : > { %v1175_v24 = vpop.permute.xlu1 %1174  ;;  %v1094_v25 = vpop.permute.xlu0 %1093 }
  0xda   : > { %2091 = vmatmul.mubr.msk.f32.vlgmr.msra.gmra.mxu1 %vm230_vm2, %v1094_v25  ;;  %2094 = vmatpush3.msk.msra.mxu0 %vm233_vm1, %v1175_v24 }
  0xdb   : > { %2103 = vmatprep.subr.mxu0 %v2362_v0  ;;  %2100 = vmatprep.mubr.msk.f32.mxu1 %vm2363_vm0, %v2362_v0 }
  0xdd   : > { %v1254_v26 = vpop.permute.xlu1 %1253  ;;  %v1173_v27 = vpop.permute.xlu0 %1172 }
  0xde   : > { %2096 = vmatmul.mubr.msk.f32.vlgmr.msra.gmra.mxu0 %vm230_vm2, %v1173_v27  ;;  %2099 = vmatpush3.msk.msra.mxu1 %vm233_vm1, %v1254_v26 }
  0xdf   : > { %2105 = vmatprep.mubr.msk.f32.mxu0 %vm2363_vm0, %v2362_v0  ;;  %2108 = vmatprep.subr.mxu1 %v2362_v0 }
  0xe1   : > { %v1333_v28 = vpop.permute.xlu1 %1332  ;;  %v1252_v29 = vpop.permute.xlu0 %1251 }
  0xe2   : > { %2101 = vmatmul.mubr.msk.f32.vlgmr.msra.gmra.mxu1 %vm230_vm2, %v1252_v29  ;;  %2104 = vmatpush3.msk.msra.mxu0 %vm233_vm1, %v1333_v28  ;;  %v2382_v28 = vmov 1966171168  }
  0xe3   : > { %2110 = vmatprep.mubr.msk.f32.mxu1 %vm2363_vm0, %v2362_v0  ;;  %v1517_v29 = vunpack.c.l.s4 %v2382_v28 }
  0xe5   : > { %v1412_v30 = vpop.permute.xlu1 %1411  ;;  %v1331_v31 = vpop.permute.xlu0 %1330 }
  0xe6   : > { %2106 = vmatmul.mubr.msk.f32.vlgmr.msra.gmra.mxu0 %vm230_vm2, %v1331_v31  ;;  %2109 = vmatpush3.msk.msra.mxu1 %vm233_vm1, %v1412_v30  ;;  %v1519_v30 = vlaneseq  ;;  %v1518_v31 = vunpack.c.0.s8 %v1517_v29 }
  0xe9   : > { %v1410_v32 = vpop.permute.xlu0 %1409 }
  0xea   : > { %2111 = vmatmul.mubr.msk.f32.vlgmr.msra.gmra.mxu1 %vm230_vm2, %v1410_v32  ;;  %v1520_v32 = vshrl.u32 %v1519_v30, 7 }
 0x105   : > { %v378_v33 = vpop.f32.mrf.mxu1 }
 0x107   : > { %v2042_v34 = vpop.f32.mrf.mxu1 }
 0x176   : > { %v303_v35 = vpop.f32.mrf.mxu0 }
 0x177   : > { %v379_v47 = vadd.f32 %v378_v33, %v303_v35  ;;  %v1521_v35 = vsub.s32 %v1518_v31, %v1520_v32 }
 0x178   : > { %v2037_v36 = vpop.f32.mrf.mxu0 }
 0x17b   : > { %v456_v37 = vpop.f32.mrf.mxu0 }
 0x17c   : > { %v460_v49 = vadd.f32 %v456_v37, %v379_v47 }
 0x17d   : > { %v2047_v38 = vpop.f32.mrf.mxu0 }
 0x17e   : > { %v535_v39 = vpop.f32.mrf.mxu1  ;;  %v1583_v38 = vsub.s32 0, %v1520_v32 }
 0x17f   : > { %v614_v40 = vpop.f32.mrf.mxu0  ;;  %v539_v52 = vadd.f32 %v535_v39, %v460_v49 }
 0x180   : > { %v2052_v41 = vpop.f32.mrf.mxu1 }
 0x181   : > { %v2057_v42 = vpop.f32.mrf.mxu0  ;;  %v618_v55 = vadd.f32 %v614_v40, %v539_v52 }
 0x182   : > { %v693_v43 = vpop.f32.mrf.mxu1 }
 0x183   : > { %v697_v58 = vadd.f32 %v693_v43, %v618_v55 }
 0x184   : > { %v2062_v44 = vpop.f32.mrf.mxu1 }
 0x186   : > { %v772_v45 = vpop.f32.mrf.mxu0 }
 0x187   : > { %v776_v60 = vadd.f32 %v772_v45, %v697_v58 }
 0x188   : > { %v2067_v46 = vpop.f32.mrf.mxu0 }
 0x18a   : > { %v851_v48 = vpop.f32.mrf.mxu1 }
 0x18b   : > { %v855_v62 = vadd.f32 %v851_v48, %v776_v60 }
 0x18c   : > { %v2072_v50 = vpop.f32.mrf.mxu1 }
 0x18e   : > { %v930_v51 = vpop.f32.mrf.mxu0 }
 0x18f   : > { %v934_v0 = vadd.f32 %v930_v51, %v855_v62 }
 0x190   : > { %v2077_v53 = vpop.f32.mrf.mxu0 }
 0x192   : > { %v1009_v54 = vpop.f32.mrf.mxu1 }
 0x193   : > { %v1013_v2 = vadd.f32 %v1009_v54, %v934_v0 }
 0x194   : > { %v2082_v56 = vpop.f32.mrf.mxu1 }
 0x196   : > { %v1088_v57 = vpop.f32.mrf.mxu0 }
 0x197   : > { %v1092_v4 = vadd.f32 %v1088_v57, %v1013_v2 }
 0x198   : > { %v2087_v59 = vpop.f32.mrf.mxu0 }
 0x19a   : > { %v1167_v61 = vpop.f32.mrf.mxu1 }
 0x19b   : > { %v1171_v6 = vadd.f32 %v1167_v61, %v1092_v4 }
 0x19c   : > { %v2092_v63 = vpop.f32.mrf.mxu1 }
 0x19e   : > { %v1246_v1 = vpop.f32.mrf.mxu0 }
 0x19f   : > { %v1250_v8 = vadd.f32 %v1246_v1, %v1171_v6 }
 0x1a0   : > { %v2097_v3 = vpop.f32.mrf.mxu0 }
 0x1a2   : > { %v1325_v5 = vpop.f32.mrf.mxu1 }
 0x1a3   : > { %v1329_v10 = vadd.f32 %v1325_v5, %v1250_v8 }
 0x1a4   : > { %v2102_v7 = vpop.f32.mrf.mxu1 }
 0x1a6   : > { %v1404_v9 = vpop.f32.mrf.mxu0 }
 0x1a7   : > { %v1408_v12 = vadd.f32 %v1404_v9, %v1329_v10 }
 0x1a8   : > { %v2107_v11 = vpop.f32.mrf.mxu0 }
 0x1aa   : > { %v1483_v13 = vpop.f32.mrf.mxu1 }
 0x1ab   : > { %v1487_v15 = vadd.f32 %v1483_v13, %v1408_v12 }
 0x1ac   : > { %v2112_v16 = vpop.f32.mrf.mxu1 }
 0x1ad   : > { %v1495_v17 = vmul.f32 %v1993_v14, %v1487_v15 }
 0x1af   : > { %v1497_v18 = vsel %vm1496_vm3, %v1495_v17, 0.0 }
 0x1b0   : > { %1498 = vadd.xlane.f32.xlu1 %v1497_v18 }
 0x239   : > { %v1499_v19 = vpop.xlane.xlu1 %1498 }
 0x23a   : > { %v1500_v20 = vmul.f32 0.015625, %v1499_v19 }
 0x23c   : > { %v1501_v21 = vsub.f32 %v1487_v15, %v1500_v20 }
 0x23e   : > { %v1502_v22 = vmul.f32 %v1993_v14, %v1501_v21 }
 0x240   : > { %v1503_v23 = vmul.f32 %v1502_v22, %v1502_v22 }
 0x242   : > { %v1504_v24 = vsel %vm1496_vm3, %v1503_v23, 0.0 }
 0x243   : > { %1505 = vadd.xlane.f32.xlu0 %v1504_v24 }
 0x2cc   : > { %v1506_v25 = vpop.xlane.xlu0 %1505 }
 0x2cd   : > { %v1507_v26 = vmul.f32 0.015625, %v1506_v25 }
 0x2cf   : > { %v1508_v27 = vadd.f32 1e-05, %v1507_v26 }
 0x2d1   : > { %2216 = vrsqrt.f32 %v1508_v27 }
 0x2de   : > { %v2217_v33 = vpop.eup %2216 }
 0x2df   : > { %v1510_v34 = vmul.f32 %v2217_v33, %v1501_v21 }
 0x2e1   : > { %vm1511_vm4 = vcmp.ge.f32.partialorder %v1510_v34, 0.0  ;;  %v1512_v36 = vmul.f32 0.2, %v1510_v34 }
 0x2e3   : > { %v1513_v37 = vsel %vm1511_vm4, %v1510_v34, %v1512_v36 }
 0x2e4   : > { %v1515_v39 = vcombine.high %v1513_v37, %v1513_v37  ;;  %v1522_v40 = vrot.slane %v1513_v37, %v1521_v35 }
 0x2e6   : > { %v1529_v41 = vrot.slane %v1515_v39, %v1521_v35  ;;  %v1530_v42 = vcombine.high %v1522_v40, %v1522_v40  ;;  %v1538_v43 = vrot.slane %v1522_v40, %v1521_v35 }
 0x2e8   : > { %v1531_v44 = vcombine.high %v1529_v41, %v1529_v41  ;;  %v1545_v45 = vrot.slane %v1529_v41, %v1521_v35  ;;  %v1552_v46 = vrot.slane %v1530_v42, %v1521_v35  ;;  %1573 = vst.msk [vmem:[%s2629_s19] sm:$0x1] %vm1572_vm5, %v1538_v43  ;;  %v1584_v47 = vrot.slane %v1538_v43, %v1583_v38 }
 0x2e9   : > { %v1560_v48 = vcombine.high %v1538_v43, %v1538_v43 }
 0x2ea   : > { %v1559_v49 = vrot.slane %v1531_v44, %v1521_v35  ;;  %1574 = vst.msk [vmem:[%s2629_s19 + $0x8] sm:$0x1] %vm1572_vm5, %v1552_v46  ;;  %1577 = vst.msk [vmem:[%s2629_s19 + $0x20] sm:$0x1] %vm1572_vm5, %v1545_v45  ;;  %1645 = vrot.lane.b32.xlu1 %v1584_v47, %s2383_s22  ;;  %1613 = vrot.lane.b32.xlu0 %v1584_v47, %s2371_s30  ;;  %v1562_v50 = vcombine.high %v1552_v46, %v1552_v46 }
 0x2eb   : > { %1575 = vst.msk [vmem:[%s2629_s19 + $0x10] sm:$0x1] %vm1572_vm5, %v1560_v48  ;;  %v1561_v51 = vcombine.high %v1545_v45, %v1545_v45  ;;  %v1588_v52 = vrot.slane %v1552_v46, %v1583_v38  ;;  %v1592_v56 = vrot.slane %v1560_v48, %v1583_v38  ;;  %v1600_v58 = vrot.slane %v1545_v45, %v1583_v38 }
 0x2ec   : > { %1578 = vst.msk [vmem:[%s2629_s19 + $0x28] sm:$0x1] %vm1572_vm5, %v1559_v49  ;;  %1576 = vst.msk [vmem:[%s2629_s19 + $0x18] sm:$0x1] %vm1572_vm5, %v1562_v50  ;;  %v1563_v53 = vcombine.high %v1559_v49, %v1559_v49  ;;  %v1596_v57 = vrot.slane %v1562_v50, %v1583_v38  ;;  %v1604_v59 = vrot.slane %v1559_v49, %v1583_v38 }
 0x2ed   : > { %v2645_v54 = vrot.slane %v1561_v51, %v1583_v38  ;;  %1579 = vst.msk [vmem:[%s2629_s19 + $0x30] sm:$0x1] %vm1572_vm5, %v1561_v51 }
 0x2ee   : > { %1677 = vrot.lane.b32.xlu1 %v1584_v47, %s2384_s27  ;;  %1647 = vrot.lane.b32.xlu0 %v1588_v52, %s2383_s22  ;;  %v1612_v55 = vrot.slane %v1563_v53, %v1583_v38  ;;  %1580 = vst.msk [vmem:[%s2629_s19 + $0x38] sm:$0x1] %vm1572_vm5, %v1563_v53 }
 0x2f2   : > { %1709 = vrot.lane.b32.xlu1 %v1584_v47, %s2375_s10  ;;  %1679 = vrot.lane.b32.xlu0 %v1588_v52, %s2384_s27 }
 0x2f6   : > { %1741 = vrot.lane.b32.xlu1 %v1584_v47, %s2385_s7  ;;  %1711 = vrot.lane.b32.xlu0 %v1588_v52, %s2375_s10 }
 0x2fa   : > { %1773 = vrot.lane.b32.xlu1 %v1584_v47, %s2386_s28  ;;  %1743 = vrot.lane.b32.xlu0 %v1588_v52, %s2385_s7 }
 0x2fe   : > { %1805 = vrot.lane.b32.xlu1 %v1584_v47, %s2387_s8  ;;  %1775 = vrot.lane.b32.xlu0 %v1588_v52, %s2386_s28 }
 0x302   : > { %1807 = vrot.lane.b32.xlu0 %v1588_v52, %s2387_s8  ;;  %1615 = vrot.lane.b32.xlu1 %v1588_v52, %s2371_s30 }
 0x306   : > { %1617 = vrot.lane.b32.xlu1 %v1592_v56, %s2371_s30  ;;  %1619 = vrot.lane.b32.xlu0 %v1596_v57, %s2371_s30 }
 0x30a   : > { %1621 = vrot.lane.b32.xlu1 %v1600_v58, %s2371_s30  ;;  %1623 = vrot.lane.b32.xlu0 %v1604_v59, %s2371_s30 }
 0x30e   : > { %1649 = vrot.lane.b32.xlu1 %v1592_v56, %s2383_s22  ;;  %1651 = vrot.lane.b32.xlu0 %v1596_v57, %s2383_s22 }
 0x312   : > { %1653 = vrot.lane.b32.xlu1 %v1600_v58, %s2383_s22  ;;  %1655 = vrot.lane.b32.xlu0 %v1604_v59, %s2383_s22 }
 0x316   : > { %1681 = vrot.lane.b32.xlu1 %v1592_v56, %s2384_s27  ;;  %1683 = vrot.lane.b32.xlu0 %v1596_v57, %s2384_s27 }
 0x31a   : > { %1685 = vrot.lane.b32.xlu1 %v1600_v58, %s2384_s27  ;;  %1687 = vrot.lane.b32.xlu0 %v1604_v59, %s2384_s27 }
 0x31e   : > { %1713 = vrot.lane.b32.xlu1 %v1592_v56, %s2375_s10  ;;  %1715 = vrot.lane.b32.xlu0 %v1596_v57, %s2375_s10 }
 0x322   : > { %1717 = vrot.lane.b32.xlu1 %v1600_v58, %s2375_s10  ;;  %1719 = vrot.lane.b32.xlu0 %v1604_v59, %s2375_s10 }
 0x326   : > { %1745 = vrot.lane.b32.xlu1 %v1592_v56, %s2385_s7  ;;  %1747 = vrot.lane.b32.xlu0 %v1596_v57, %s2385_s7 }
 0x32a   : > { %1749 = vrot.lane.b32.xlu1 %v1600_v58, %s2385_s7  ;;  %1751 = vrot.lane.b32.xlu0 %v1604_v59, %s2385_s7 }
 0x32e   : > { %1777 = vrot.lane.b32.xlu1 %v1592_v56, %s2386_s28  ;;  %1779 = vrot.lane.b32.xlu0 %v1596_v57, %s2386_s28 }
 0x332   : > { %1781 = vrot.lane.b32.xlu1 %v1600_v58, %s2386_s28  ;;  %1783 = vrot.lane.b32.xlu0 %v1604_v59, %s2386_s28 }
 0x336   : > { %1809 = vrot.lane.b32.xlu1 %v1592_v56, %s2387_s8  ;;  %1811 = vrot.lane.b32.xlu0 %v1596_v57, %s2387_s8 }
 0x33a   : > { %1813 = vrot.lane.b32.xlu1 %v1600_v58, %s2387_s8  ;;  %1815 = vrot.lane.b32.xlu0 %v1604_v59, %s2387_s8 }
 0x33e   : > { %1625 = vrot.lane.b32.xlu1 %v2645_v54, %s2371_s30  ;;  %1627 = vrot.lane.b32.xlu0 %v1612_v55, %s2371_s30  ;;  %s2000_s30 = sshll.u32 %s2348_s15, 10  ;;  %s1838_s15 = scalar_lea.sflag [#allocation4], %s2522_s5 }
 0x33f   : > { %s2825_s11 = scalar_lea.hbm %s2882_s3, %s2000_s30 }
 0x342   : > { %1657 = vrot.lane.b32.xlu1 %v2645_v54, %s2383_s22  ;;  %1659 = vrot.lane.b32.xlu0 %v1612_v55, %s2383_s22 }
 0x346   : > { %1689 = vrot.lane.b32.xlu1 %v2645_v54, %s2384_s27  ;;  %1691 = vrot.lane.b32.xlu0 %v1612_v55, %s2384_s27 }
 0x34a   : > { %1721 = vrot.lane.b32.xlu1 %v2645_v54, %s2375_s10  ;;  %1723 = vrot.lane.b32.xlu0 %v1612_v55, %s2375_s10  ;;  %s1853_s10 = sshll.u32 %s2629_s19, 4  ;;  %s2827_s10 = int_to_ptr.vmem [resolvable:$true] %s1853_s10 }
 0x34b   : > { %s2272_s18 = scalar_lea.vmem %s2827_s10, 1024  ;;  %p2279_p12 = scmp.lt.s32.totalorder %s2827_s10, %s2277_s23 }
 0x34c   : > { %p2273_p3 = scmp.ne.s32.totalorder %s2827_s10, %s2272_s18  ;;  %p2280_p7 = scmp.lt.s32.totalorder %s2278_s21, %s2272_s18 }
 0x34e   : > { %1753 = vrot.lane.b32.xlu1 %v2645_v54, %s2385_s7  ;;  %1755 = vrot.lane.b32.xlu0 %v1612_v55, %s2385_s7  ;;  %p2274_p4 = pnand %p2273_p3, %p2896_p13  ;;  %p2281_p8 = por %p2280_p7, %p2279_p12 }
 0x350   : > { %p2275_p1 = pneg %p2274_p4 }
 0x352   : > { %1785 = vrot.lane.b32.xlu1 %v2645_v54, %s2386_s28  ;;  %1787 = vrot.lane.b32.xlu0 %v1612_v55, %s2386_s28  ;;  %p2282_p9 = pnand %p2281_p8, %p2275_p1 }
 0x356   : > { %1817 = vrot.lane.b32.xlu1 %v2645_v54, %s2387_s8  ;;  %1819 = vrot.lane.b32.xlu0 %v1612_v55, %s2387_s8 }
 0x35c   : > { %v1646_v60 = vpop.permute.xlu1 %1645  ;;  %v1614_v61 = vpop.permute.xlu0 %1613 }
 0x35d   : > { %1669 = vst.msk [vmem:[%s2629_s19 + $0x2] sm:$0x1] %vm1572_vm5, %v1646_v60  ;;  %1637 = vst.msk [vmem:[%s2629_s19 + $0x1] sm:$0x1] %vm1572_vm5, %v1614_v61 }
 0x360   : > { %v1678_v62 = vpop.permute.xlu1 %1677  ;;  %v1648_v63 = vpop.permute.xlu0 %1647 }
 0x361   : > { %1701 = vst.msk [vmem:[%s2629_s19 + $0x3] sm:$0x1] %vm1572_vm5, %v1678_v62  ;;  %1670 = vst.msk [vmem:[%s2629_s19 + $0xa] sm:$0x1] %vm1572_vm5, %v1648_v63 }
 0x364   : > { %v1710_v0 = vpop.permute.xlu1 %1709  ;;  %v1680_v1 = vpop.permute.xlu0 %1679 }
 0x365   : > { %1733 = vst.msk [vmem:[%s2629_s19 + $0x4] sm:$0x1] %vm1572_vm5, %v1710_v0  ;;  %1702 = vst.msk [vmem:[%s2629_s19 + $0xb] sm:$0x1] %vm1572_vm5, %v1680_v1 }
 0x368   : > { %v1742_v2 = vpop.permute.xlu1 %1741  ;;  %v1712_v3 = vpop.permute.xlu0 %1711 }
 0x369   : > { %1765 = vst.msk [vmem:[%s2629_s19 + $0x5] sm:$0x1] %vm1572_vm5, %v1742_v2  ;;  %1734 = vst.msk [vmem:[%s2629_s19 + $0xc] sm:$0x1] %vm1572_vm5, %v1712_v3 }
 0x36c   : > { %v1774_v4 = vpop.permute.xlu1 %1773  ;;  %v1744_v5 = vpop.permute.xlu0 %1743 }
 0x36d   : > { %1797 = vst.msk [vmem:[%s2629_s19 + $0x6] sm:$0x1] %vm1572_vm5, %v1774_v4  ;;  %1766 = vst.msk [vmem:[%s2629_s19 + $0xd] sm:$0x1] %vm1572_vm5, %v1744_v5 }
 0x370   : > { %v1806_v6 = vpop.permute.xlu1 %1805  ;;  %v1776_v7 = vpop.permute.xlu0 %1775 }
 0x371   : > { %1829 = vst.msk [vmem:[%s2629_s19 + $0x7] sm:$0x1] %vm1572_vm5, %v1806_v6  ;;  %1798 = vst.msk [vmem:[%s2629_s19 + $0xe] sm:$0x1] %vm1572_vm5, %v1776_v7 }
 0x374   : > { %v1808_v8 = vpop.permute.xlu0 %1807  ;;  %v1616_v9 = vpop.permute.xlu1 %1615 }
 0x375   : > { %1830 = vst.msk [vmem:[%s2629_s19 + $0xf] sm:$0x1] %vm1572_vm5, %v1808_v8  ;;  %1638 = vst.msk [vmem:[%s2629_s19 + $0x9] sm:$0x1] %vm1572_vm5, %v1616_v9 }
 0x378   : > { %v1618_v10 = vpop.permute.xlu1 %1617  ;;  %v1620_v11 = vpop.permute.xlu0 %1619 }
 0x379   : > { %1639 = vst.msk [vmem:[%s2629_s19 + $0x11] sm:$0x1] %vm1572_vm5, %v1618_v10  ;;  %1640 = vst.msk [vmem:[%s2629_s19 + $0x19] sm:$0x1] %vm1572_vm5, %v1620_v11 }
 0x37c   : > { %v1622_v12 = vpop.permute.xlu1 %1621  ;;  %v1624_v13 = vpop.permute.xlu0 %1623 }
 0x37d   : > { %1641 = vst.msk [vmem:[%s2629_s19 + $0x21] sm:$0x1] %vm1572_vm5, %v1622_v12  ;;  %1642 = vst.msk [vmem:[%s2629_s19 + $0x29] sm:$0x1] %vm1572_vm5, %v1624_v13 }
 0x380   : > { %v1650_v14 = vpop.permute.xlu1 %1649  ;;  %v1652_v15 = vpop.permute.xlu0 %1651 }
 0x381   : > { %1671 = vst.msk [vmem:[%s2629_s19 + $0x12] sm:$0x1] %vm1572_vm5, %v1650_v14  ;;  %1672 = vst.msk [vmem:[%s2629_s19 + $0x1a] sm:$0x1] %vm1572_vm5, %v1652_v15 }
 0x384   : > { %v1654_v16 = vpop.permute.xlu1 %1653  ;;  %v1656_v17 = vpop.permute.xlu0 %1655 }
 0x385   : > { %1673 = vst.msk [vmem:[%s2629_s19 + $0x22] sm:$0x1] %vm1572_vm5, %v1654_v16  ;;  %1674 = vst.msk [vmem:[%s2629_s19 + $0x2a] sm:$0x1] %vm1572_vm5, %v1656_v17 }
 0x388   : > { %v1682_v18 = vpop.permute.xlu1 %1681  ;;  %v1684_v19 = vpop.permute.xlu0 %1683 }
 0x389   : > { %1703 = vst.msk [vmem:[%s2629_s19 + $0x13] sm:$0x1] %vm1572_vm5, %v1682_v18  ;;  %1704 = vst.msk [vmem:[%s2629_s19 + $0x1b] sm:$0x1] %vm1572_vm5, %v1684_v19 }
 0x38c   : > { %v1686_v20 = vpop.permute.xlu1 %1685  ;;  %v1688_v21 = vpop.permute.xlu0 %1687 }
 0x38d   : > { %1705 = vst.msk [vmem:[%s2629_s19 + $0x23] sm:$0x1] %vm1572_vm5, %v1686_v20  ;;  %1706 = vst.msk [vmem:[%s2629_s19 + $0x2b] sm:$0x1] %vm1572_vm5, %v1688_v21 }
 0x390   : > { %v1714_v22 = vpop.permute.xlu1 %1713  ;;  %v1716_v23 = vpop.permute.xlu0 %1715 }
 0x391   : > { %1735 = vst.msk [vmem:[%s2629_s19 + $0x14] sm:$0x1] %vm1572_vm5, %v1714_v22  ;;  %1736 = vst.msk [vmem:[%s2629_s19 + $0x1c] sm:$0x1] %vm1572_vm5, %v1716_v23 }
 0x394   : > { %v1718_v24 = vpop.permute.xlu1 %1717  ;;  %v1720_v25 = vpop.permute.xlu0 %1719 }
 0x395   : > { %1737 = vst.msk [vmem:[%s2629_s19 + $0x24] sm:$0x1] %vm1572_vm5, %v1718_v24  ;;  %1738 = vst.msk [vmem:[%s2629_s19 + $0x2c] sm:$0x1] %vm1572_vm5, %v1720_v25 }
 0x398   : > { %v1746_v26 = vpop.permute.xlu1 %1745  ;;  %v1748_v27 = vpop.permute.xlu0 %1747 }
 0x399   : > { %1767 = vst.msk [vmem:[%s2629_s19 + $0x15] sm:$0x1] %vm1572_vm5, %v1746_v26  ;;  %1768 = vst.msk [vmem:[%s2629_s19 + $0x1d] sm:$0x1] %vm1572_vm5, %v1748_v27 }
 0x39c   : > { %v1750_v28 = vpop.permute.xlu1 %1749  ;;  %v1752_v29 = vpop.permute.xlu0 %1751 }
 0x39d   : > { %1769 = vst.msk [vmem:[%s2629_s19 + $0x25] sm:$0x1] %vm1572_vm5, %v1750_v28  ;;  %1770 = vst.msk [vmem:[%s2629_s19 + $0x2d] sm:$0x1] %vm1572_vm5, %v1752_v29 }
 0x3a0   : > { %v1778_v30 = vpop.permute.xlu1 %1777  ;;  %v1780_v31 = vpop.permute.xlu0 %1779 }
 0x3a1   : > { %1799 = vst.msk [vmem:[%s2629_s19 + $0x16] sm:$0x1] %vm1572_vm5, %v1778_v30  ;;  %1800 = vst.msk [vmem:[%s2629_s19 + $0x1e] sm:$0x1] %vm1572_vm5, %v1780_v31 }
 0x3a4   : > { %v1782_v32 = vpop.permute.xlu1 %1781  ;;  %v1784_v33 = vpop.permute.xlu0 %1783 }
 0x3a5   : > { %1801 = vst.msk [vmem:[%s2629_s19 + $0x26] sm:$0x1] %vm1572_vm5, %v1782_v32  ;;  %1802 = vst.msk [vmem:[%s2629_s19 + $0x2e] sm:$0x1] %vm1572_vm5, %v1784_v33 }
 0x3a8   : > { %v1810_v34 = vpop.permute.xlu1 %1809  ;;  %v1812_v35 = vpop.permute.xlu0 %1811 }
 0x3a9   : > { %1831 = vst.msk [vmem:[%s2629_s19 + $0x17] sm:$0x1] %vm1572_vm5, %v1810_v34  ;;  %1832 = vst.msk [vmem:[%s2629_s19 + $0x1f] sm:$0x1] %vm1572_vm5, %v1812_v35 }
 0x3ac   : > { %v1814_v36 = vpop.permute.xlu1 %1813  ;;  %v1816_v37 = vpop.permute.xlu0 %1815 }
 0x3ad   : > { %1833 = vst.msk [vmem:[%s2629_s19 + $0x27] sm:$0x1] %vm1572_vm5, %v1814_v36  ;;  %1834 = vst.msk [vmem:[%s2629_s19 + $0x2f] sm:$0x1] %vm1572_vm5, %v1816_v37 }
 0x3b0   : > { %v1626_v38 = vpop.permute.xlu1 %1625  ;;  %v1628_v39 = vpop.permute.xlu0 %1627 }
 0x3b1   : > { %1643 = vst.msk [vmem:[%s2629_s19 + $0x31] sm:$0x1] %vm1572_vm5, %v1626_v38  ;;  %1644 = vst.msk [vmem:[%s2629_s19 + $0x39] sm:$0x1] %vm1572_vm5, %v1628_v39 }
 0x3b4   : > { %v1658_v40 = vpop.permute.xlu1 %1657  ;;  %v1660_v41 = vpop.permute.xlu0 %1659 }
 0x3b5   : > { %1675 = vst.msk [vmem:[%s2629_s19 + $0x32] sm:$0x1] %vm1572_vm5, %v1658_v40  ;;  %1676 = vst.msk [vmem:[%s2629_s19 + $0x3a] sm:$0x1] %vm1572_vm5, %v1660_v41 }
 0x3b8   : > { %v1690_v42 = vpop.permute.xlu1 %1689  ;;  %v1692_v43 = vpop.permute.xlu0 %1691 }
 0x3b9   : > { %1707 = vst.msk [vmem:[%s2629_s19 + $0x33] sm:$0x1] %vm1572_vm5, %v1690_v42  ;;  %1708 = vst.msk [vmem:[%s2629_s19 + $0x3b] sm:$0x1] %vm1572_vm5, %v1692_v43 }
 0x3bc   : > { %v1722_v44 = vpop.permute.xlu1 %1721  ;;  %v1724_v45 = vpop.permute.xlu0 %1723 }
 0x3bd   : > { %1739 = vst.msk [vmem:[%s2629_s19 + $0x34] sm:$0x1] %vm1572_vm5, %v1722_v44  ;;  %1740 = vst.msk [vmem:[%s2629_s19 + $0x3c] sm:$0x1] %vm1572_vm5, %v1724_v45 }
 0x3c0   : > { %v1754_v46 = vpop.permute.xlu1 %1753  ;;  %v1756_v47 = vpop.permute.xlu0 %1755 }
 0x3c1   : > { %1771 = vst.msk [vmem:[%s2629_s19 + $0x35] sm:$0x1] %vm1572_vm5, %v1754_v46  ;;  %1772 = vst.msk [vmem:[%s2629_s19 + $0x3d] sm:$0x1] %vm1572_vm5, %v1756_v47 }
 0x3c4   : > { %v1786_v48 = vpop.permute.xlu1 %1785  ;;  %v1788_v49 = vpop.permute.xlu0 %1787 }
 0x3c5   : > { %1803 = vst.msk [vmem:[%s2629_s19 + $0x36] sm:$0x1] %vm1572_vm5, %v1786_v48  ;;  %1804 = vst.msk [vmem:[%s2629_s19 + $0x3e] sm:$0x1] %vm1572_vm5, %v1788_v49 }
 0x3c8   : > { %v1818_v50 = vpop.permute.xlu1 %1817  ;;  %v1820_v51 = vpop.permute.xlu0 %1819 }
 0x3c9   : > { %1835 = vst.msk [vmem:[%s2629_s19 + $0x37] sm:$0x1] %vm1572_vm5, %v1818_v50  ;;  %1836 = vst.msk [vmem:[%s2629_s19 + $0x3f] sm:$0x1] %vm1572_vm5, %v1820_v51 }
 0x3ca   : > { %2285 = shalt.err (!%p2282_p9)
}
 0x3cb   : > { %s2286_s26 = scalar_lea.hbm %s2825_s11, 1024  ;;  %s2290_s22 = scalar_lea.hbm %s2882_s3, 2048 }
 0x3cc   : > { %p2287_p0 = scmp.ne.s32.totalorder %s2825_s11, %s2286_s26  ;;  %p2291_p10 = scmp.lt.s32.totalorder %s2825_s11, %s2882_s3 }
 0x3cd   : > { %p2292_p11 = scmp.lt.s32.totalorder %s2290_s22, %s2286_s26 }
 0x3ce   : > { %p2288_p2 = pnand %p2287_p0, %p2896_p13 }
 0x3cf   : > { %p2293_p5 = por %p2292_p11, %p2291_p10 }
 0x3d0   : > { %p2289_p6 = pneg %p2288_p2 }
 0x3d2   : > { %p2294_p3 = pnand %p2293_p5, %p2289_p6 }
 0x3d4   : > { %2297 = shalt.err (!%p2294_p3)
}
 0x3d5   : > { %s2389_s28 = smov 128   ;;  %s2390_s8 = smov 8  }
 0x3d6   : > { %2119 = dma.vmem_to_hbm [thread:$0]  (%p2896_p13), %s2827_s10, 1024, %s2825_s11, %s1838_s15, %s2389_s28, %s2389_s28, %s2390_s8  }
 0x3d7 PF: > { %s1868_s30 = sand.u32 1, %s2336_s12   ;;  %p2897_p4 = scmp.ne.s32.totalorder %s2890_s25, 0 }
 0x3d8   : > { %p2898_p1 = scmp.ge.s32.totalorder %s2356_s17, 2  ;;  %s1869_s9 = scalar_lea.sflag [#allocation4], %s1868_s30 }
 0x3da   : > { %p2130_p12 = pnand %p2898_p1, %p2897_p4 }
 0x3dc   : > { %p2131_p7 = pneg %p2130_p12 }
 0x3de   : > { %2331 = dma.done.wait (%p2131_p7), %s1869_s9, 1024  }
 0x3df   : > { %2333 = vsyncadd (%p2131_p7), %s1869_s9, 4294966272  ;;  %s20_s17 = sadd.s32 1, %s2356_s17   ;;  %s2899_s12 = smov %s2340_s13 }
 0x3e0   : > { %p17_p8 = scmp.ge.s32.totalorder %s20_s17, 4   ;;  %s2900_s13 = smov %s2344_s14 }
 0x3e1   : > { %s2901_s14 = smov %s2513_s6  ;;  %s2902_s15 = smov %s2352_s16 }
 0x3e2   : > { %s2903_s16 = smov %s2905_s4  ;;  %19 = sbr.rel (!%p17_p8) target bundleno = 9 (0x9), region = 82 }
 0x3e7   :  { %1874 = vsyncpa [#allocation3], 1 }
 0x3e8   :  { %1876 = vsyncpa [#allocation3 + $0x1], 1 }
 0x3e9   :  { %1877 = vsyncpa [#allocation6], 1 }
 0x3ea   :  { %1878 = vsyncpa [#allocation4], 1 }
 0x3eb   :  { %1880 = vsyncpa [#allocation4 + $0x1], 1 }

</bundles_post_ra>
